<compile_context>
chip_gen: v7x
topology: tpu7x:2x2x1
jax: 0.10.0
libtpu: 0.0.40
codegen_flags: <defaults>
</compile_context>

<pallas_src>
import jax
import jax.numpy as jnp
from jax.experimental import pallas as pl
from jax.experimental.pallas import tpu as pltpu


def _round_up(x: int, m: int) -> int:
    return (x + m - 1) // m * m


def chess_mlp_kernel(x_ref, w1_ref, b1_ref, w2_ref, b2_ref, o_ref):
    # nn.Flatten happened in the wrapper (zero-cost reshape).
    # Cast activations to bf16 in-kernel (no wrapper-side HBM cast pass).
    x = x_ref[...].astype(jnp.bfloat16)
    # Linear 1 (MXU, bf16 operands, f32 accumulate) + bias + ReLU in f32 (VPU).
    h = jnp.dot(x, w1_ref[...], preferred_element_type=jnp.float32)
    h = jnp.maximum(h + b1_ref[...], 0.0)          # (1, HID_P) broadcasts
    # Linear 2 (MXU) + bias -> f32 logits.
    o = jnp.dot(h.astype(jnp.bfloat16), w2_ref[...],
                preferred_element_type=jnp.float32)
    o_ref[...] = o + b2_ref[...]


def prepare_chess_weights(w1_torch, b1, w2_torch, b2):
    """One-time weight preparation (run once, NOT per forward call).

    Takes PyTorch nn.Linear parameters (weight: (out, in), bias: (out,)) and
    returns MXU-ready operands in x @ W layout:
        w1p: (D, HID_P) bf16     b1p: (1, HID_P) f32
        w2p: (HID_P, M_P) bf16   b2p: (1, M_P)  f32
    Hidden and move dims are zero-padded to multiples of 128 lanes; the zero
    columns are inert through ReLU / the second matmul, and padded logits
    columns hold only the (zero) bias.
    """
    w1_torch = jnp.asarray(w1_torch, jnp.float32)
    w2_torch = jnp.asarray(w2_torch, jnp.float32)
    b1 = jnp.asarray(b1, jnp.float32).reshape(1, -1)
    b2 = jnp.asarray(b2, jnp.float32).reshape(1, -1)

    HID, D = w1_torch.shape
    M, _ = w2_torch.shape
    HID_P = _round_up(HID, 128)
    M_P = _round_up(M, 128)

    w1p = jnp.zeros((D, HID_P), jnp.float32).at[:, :HID].set(w1_torch.T)
    b1p = jnp.zeros((1, HID_P), jnp.float32).at[:, :HID].set(b1)
    w2p = jnp.zeros((HID_P, M_P), jnp.float32).at[:HID, :M].set(w2_torch.T)
    b2p = jnp.zeros((1, M_P), jnp.float32).at[:, :M].set(b2)

    # TODO(synk): on v7x an fp8 weight variant would halve resident-weight DMA;
    # only worth it for a large move-vocabulary head, so bf16 everywhere here.
    return (w1p.astype(jnp.bfloat16), b1p, w2p.astype(jnp.bfloat16), b2p)


def _choose_tb(B: int) -> int:
    # Big tiles amortize the ~0.35 us per-grid-step overhead (single-TC
    # v5e/v6e), but keep >= 2 steps whenever the batch allows so the
    # "parallel" batch axis shards across both TensorCores on v7x.
    if B <= 128:
        return _round_up(B, 8)      # single step; x is f32 (sublane = 8)
    if B <= 1024:
        return 128                  # 2..8 parallel tiles
    return 256                      # large batch: bigger tiles, still many steps


def chess_model_forward(x_nchw, w1p, b1p, w2p, b2p):
    """Fused Flatten -> Linear -> ReLU -> Linear (ChessModel.forward).

    x_nchw: (B, C, H, W) float32 board planes (NCHW, like PyTorch).
    Weights come from `prepare_chess_weights`.
    Returns f32 logits of shape (B_pad, M_P). If B was padded to a tile
    multiple the extra rows contain only the bias; the caller indexes
    [:B, :num_moves] (no in-wrapper slice -> no extra HBM pass).
    """
    B = x_nchw.shape[0]
    x2d = x_nchw.reshape(B, -1)                    # nn.Flatten (row-major)
    D = x2d.shape[1]
    HID_P = w1p.shape[1]
    M_P = w2p.shape[1]
    assert w1p.shape[0] == D, "weights prepared for a different board encoding"

    TB = _choose_tb(B)
    B_pad = _round_up(B, TB)
    if B_pad != B:                                 # only when B isn't a tile multiple
        x2d = jnp.pad(x2d, ((0, B_pad - B), (0, 0)))
    grid = (B_pad // TB,)

    flops = 2 * B_pad * (D * HID_P + HID_P * M_P)
    bytes_accessed = (B_pad * D * 4 + w1p.size * 2 + w2p.size * 2
                      + b1p.size * 4 + b2p.size * 4 + B_pad * M_P * 4)

    return pl.pallas_call(
        chess_mlp_kernel,
        out_shape=jax.ShapeDtypeStruct((B_pad, M_P), jnp.float32),
        grid=grid,
        in_specs=[
            pl.BlockSpec((TB, D),     lambda i: (i, 0)),   # activations stream (f32)
            pl.BlockSpec((D, HID_P),  lambda i: (0, 0)),   # weights VMEM-resident
            pl.BlockSpec((1, HID_P),  lambda i: (0, 0)),
            pl.BlockSpec((HID_P, M_P), lambda i: (0, 0)),
            pl.BlockSpec((1, M_P),    lambda i: (0, 0)),
        ],
        out_specs=pl.BlockSpec((TB, M_P), lambda i: (i, 0)),
        compiler_params=pltpu.CompilerParams(
            dimension_semantics=("parallel",)),
        cost_estimate=pl.CostEstimate(
            flops=flops, transcendentals=0, bytes_accessed=bytes_accessed),
    )(x2d, w1p, b1p, w2p, b2p)


if __name__ == "__main__":
    # Chess-consistent shapes: 12 piece planes on an 8x8 board, hidden=64,
    # 128 encoded moves. Batch = 256 boards -> 2 parallel grid steps of 128
    # (keeps both v7x TCs busy; near-optimal on single-TC v5e/v6e too).
    B, C, Hb, Wb = 256, 12, 8, 8
    D = C * Hb * Wb          # 768
    HID = 64
    NUM_MOVES = 128

    key = jax.random.PRNGKey(0)
    kx, k1, k2, k3, k4 = jax.random.split(key, 5)

    x = jax.random.normal(kx, (B, C, Hb, Wb), jnp.float32)

    # Deterministic PyTorch-style Linear init: U(-1/sqrt(fan_in), 1/sqrt(fan_in)),
    # stored torch-style as (out, in) weights and (out,) biases.
    bound1 = 1.0 / jnp.sqrt(jnp.float32(D))
    w1_t = jax.random.uniform(k1, (HID, D), jnp.float32, -bound1, bound1)
    b1 = jax.random.uniform(k2, (HID,), jnp.float32, -bound1, bound1)
    bound2 = 1.0 / jnp.sqrt(jnp.float32(HID))
    w2_t = jax.random.uniform(k3, (NUM_MOVES, HID), jnp.float32, -bound2, bound2)
    b2 = jax.random.uniform(k4, (NUM_MOVES,), jnp.float32, -bound2, bound2)

    # One-time prep: padding + bf16 casts happen here, never per forward call.
    params = prepare_chess_weights(w1_t, b1, w2_t, b2)

    fwd = jax.jit(chess_model_forward)
    logits = fwd(x, *params)
    jax.block_until_ready(logits)
    assert logits.shape == (B, NUM_MOVES)   # no batch/move padding at these shapes

    # Reference 1: exact PyTorch-equivalent f32 forward (loose tol for bf16 MXU).
    x2d = x.reshape(B, -1)
    ref_f32 = jnp.maximum(x2d @ w1_t.T + b1[None, :], 0.0) @ w2_t.T + b2[None, :]
    assert jnp.allclose(logits, ref_f32, atol=5e-2, rtol=5e-2)

    # Reference 2: same bf16 quantization of operands, f32 math (tight tol).
    xq = x2d.astype(jnp.bfloat16).astype(jnp.float32)
    w1q = w1_t.T.astype(jnp.bfloat16).astype(jnp.float32)
    w2q = w2_t.T.astype(jnp.bfloat16).astype(jnp.float32)
    hq = jnp.maximum(
        jnp.dot(xq, w1q, precision=jax.lax.Precision.HIGHEST) + b1[None, :], 0.0)
    ref_bf16 = jnp.dot(hq.astype(jnp.bfloat16).astype(jnp.float32), w2q,
                       precision=jax.lax.Precision.HIGHEST) + b2[None, :]
    assert jnp.allclose(logits, ref_bf16, atol=2e-3, rtol=2e-3)

    # TODO(synk): `predict()` (softmax + argsort + legality filtering) is host-side
    # Python/board logic, not kernel compute, and is intentionally left out.
    print("KERNEL_OK")
</pallas_src>

<mosaic_0001>
module attributes {stable_mosaic.version = 11 : i64} {
  func.func @chess_mlp_kernel(%arg0: i32, %arg1: memref<128x768xf32, #tpu.memory_space<vmem>>, %arg2: memref<768x128xbf16, #tpu.memory_space<vmem>>, %arg3: memref<1x128xf32, #tpu.memory_space<vmem>>, %arg4: memref<128x128xbf16, #tpu.memory_space<vmem>>, %arg5: memref<1x128xf32, #tpu.memory_space<vmem>>, %arg6: memref<128x128xf32, #tpu.memory_space<vmem>>) attributes {dimension_semantics = [#tpu.dimension_semantics<parallel>], iteration_bounds = array<i64: 2>, scalar_prefetch = 0 : i64, scratch_operands = 0 : i64, tpu.core_type = #tpu.core_type<tc>, window_params = [{transform_indices = @transform_0, window_bounds = array<i64: 128, 768>}, {pipeline_mode = #tpu.pipeline_mode<synchronous>, transform_indices = @transform_1, window_bounds = array<i64: 768, 128>}, {pipeline_mode = #tpu.pipeline_mode<synchronous>, transform_indices = @transform_2, window_bounds = array<i64: 1, 128>}, {pipeline_mode = #tpu.pipeline_mode<synchronous>, transform_indices = @transform_3, window_bounds = array<i64: 128, 128>}, {pipeline_mode = #tpu.pipeline_mode<synchronous>, transform_indices = @transform_4, window_bounds = array<i64: 1, 128>}, {transform_indices = @transform_5, window_bounds = array<i64: 128, 128>}]} {
    %c0 = arith.constant 0 : index
    %c0_0 = arith.constant 0 : index
    %0 = vector.load %arg1[%c0, %c0_0] : memref<128x768xf32, #tpu.memory_space<vmem>>, vector<128x768xf32>
    %1 = arith.truncf %0 : vector<128x768xf32> to vector<128x768xbf16>
    %c0_1 = arith.constant 0 : index
    %c0_2 = arith.constant 0 : index
    %2 = vector.load %arg2[%c0_1, %c0_2] : memref<768x128xbf16, #tpu.memory_space<vmem>>, vector<768x128xbf16>
    %cst = arith.constant dense<0.000000e+00> : vector<128x128xf32>
    %3 = tpu.matmul %1, %2, %cst {dimension_numbers = #tpu.dot_dimension_numbers<[1], [0], [0], [1], [0, 0, 1, 1], [], []>} : vector<128x768xbf16>, vector<768x128xbf16>, vector<128x128xf32> -> vector<128x128xf32>
    %c0_3 = arith.constant 0 : index
    %c0_4 = arith.constant 0 : index
    %4 = vector.load %arg3[%c0_3, %c0_4] : memref<1x128xf32, #tpu.memory_space<vmem>>, vector<1x128xf32>
    %5 = vector.broadcast %4 : vector<1x128xf32> to vector<128x128xf32>
    %6 = arith.addf %3, %5 : vector<128x128xf32>
    %cst_5 = arith.constant 0.000000e+00 : f32
    %7 = vector.broadcast %cst_5 : f32 to vector<128x128xf32>
    %8 = arith.maximumf %6, %7 : vector<128x128xf32>
    %9 = arith.truncf %8 : vector<128x128xf32> to vector<128x128xbf16>
    %c0_6 = arith.constant 0 : index
    %c0_7 = arith.constant 0 : index
    %10 = vector.load %arg4[%c0_6, %c0_7] : memref<128x128xbf16, #tpu.memory_space<vmem>>, vector<128x128xbf16>
    %cst_8 = arith.constant dense<0.000000e+00> : vector<128x128xf32>
    %11 = tpu.matmul %9, %10, %cst_8 {dimension_numbers = #tpu.dot_dimension_numbers<[1], [0], [0], [1], [0, 0, 1, 1], [], []>} : vector<128x128xbf16>, vector<128x128xbf16>, vector<128x128xf32> -> vector<128x128xf32>
    %c0_9 = arith.constant 0 : index
    %c0_10 = arith.constant 0 : index
    %12 = vector.load %arg5[%c0_9, %c0_10] : memref<1x128xf32, #tpu.memory_space<vmem>>, vector<1x128xf32>
    %13 = vector.broadcast %12 : vector<1x128xf32> to vector<128x128xf32>
    %14 = arith.addf %11, %13 : vector<128x128xf32>
    %c0_11 = arith.constant 0 : index
    %c0_12 = arith.constant 0 : index
    %15 = vector.load %arg6[%c0_11, %c0_12] : memref<128x128xf32, #tpu.memory_space<vmem>>, vector<128x128xf32>
    tpu.vector_store %arg6[%c0_11, %c0_12], %14 {strides = array<i32>} : memref<128x128xf32, #tpu.memory_space<vmem>>, vector<128x128xf32>,
    return
  }
  func.func @transform_0(%arg0: i32) -> (i32, i32) {
    %c0_i32 = arith.constant 0 : i32
    %c0_i32_0 = arith.constant 0 : i32
    return %arg0, %c0_i32 : i32, i32
  }
  func.func @transform_1(%arg0: i32) -> (i32, i32) {
    %c0_i32 = arith.constant 0 : i32
    %c0_i32_0 = arith.constant 0 : i32
    %c0_i32_1 = arith.constant 0 : i32
    return %c0_i32, %c0_i32_0 : i32, i32
  }
  func.func @transform_2(%arg0: i32) -> (i32, i32) {
    %c0_i32 = arith.constant 0 : i32
    %c0_i32_0 = arith.constant 0 : i32
    %c0_i32_1 = arith.constant 0 : i32
    return %c0_i32, %c0_i32_0 : i32, i32
  }
  func.func @transform_3(%arg0: i32) -> (i32, i32) {
    %c0_i32 = arith.constant 0 : i32
    %c0_i32_0 = arith.constant 0 : i32
    %c0_i32_1 = arith.constant 0 : i32
    return %c0_i32, %c0_i32_0 : i32, i32
  }
  func.func @transform_4(%arg0: i32) -> (i32, i32) {
    %c0_i32 = arith.constant 0 : i32
    %c0_i32_0 = arith.constant 0 : i32
    %c0_i32_1 = arith.constant 0 : i32
    return %c0_i32, %c0_i32_0 : i32, i32
  }
  func.func @transform_5(%arg0: i32) -> (i32, i32) {
    %c0_i32 = arith.constant 0 : i32
    %c0_i32_0 = arith.constant 0 : i32
    return %arg0, %c0_i32 : i32, i32
  }
}

</mosaic_0001>

<bundles_post_ra>
// kernel: chess_model_forward.1
= control target key start
LH: loop header
LB: loop body
LE: loop exit
PB: predicated region body
PF: predicated region fallthrough
CT: control target
= control target key end

     0   :  { %10 = vsyncpa [#allocation3], 0  ;;  %s2309_s0 = inlined_call_operand.vmem [shape: f32[256,768], index: 0, kind: input, shape index: {}]   ;;  %s2310_s1 = inlined_call_operand.vmem [shape: bf16[768,128], index: 1, kind: input, shape index: {}]   ;;  %s2311_s2 = inlined_call_operand.vmem [shape: f32[1,128], index: 2, kind: input, shape index: {}]   ;;  %s2312_s3 = inlined_call_operand.vmem [shape: bf16[128,128], index: 3, kind: input, shape index: {}]   ;;  %s2313_s4 = inlined_call_operand.vmem [shape: f32[1,128], index: 4, kind: input, shape index: {}]   ;;  %s2314_s5 = inlined_call_operand.hbm [shape: f32[256,128], index: 5, kind: output, shape index: {}]  }
   0x1   :  { %12 = vsyncpa [#allocation3 + $0x1], 0  ;;  %s1846_s18 = smov 0   ;;  %s1848_s19 = smov 0  }
   0x2   :  { %s1850_s20 = smov 0   ;;  %s1852_s21 = smov 0  }
   0x3 LB: > { %s1867_s22 = sadd.s32 4294967295, %s1811_s21   ;;  %s1340_s23 = sadd.s32 4294967294, %s1811_s21   ;;  %s1811_s21 = sphi %s1852_s21, %s2320_s21   ;;  %s1807_s20 = sphi %s1850_s20, %s2319_s20   ;;  %s1803_s19 = sphi %s1848_s19, %s2318_s19   ;;  %s1799_s18 = sphi %s1846_s18, %s2317_s18  }
   0x4   : > { %s1871_s24 = sadd.s32 1, %s1811_s21   ;;  %s135_s25 = sadd.s32 1, %s1807_s20 }
   0x5   : > { %s132_s26 = ssub.s32 %s1811_s21, %s1871_s24  ;;  %p145_p0 = scmp.ne.s32.totalorder %s1807_s20, %s1803_s19 }
   0x6   : > { %p133_p1 = scmp.eq.s32.totalorder %s132_s26, 0  ;;  %p146_p2 = scmp.eq.s32.totalorder %s1867_s22, 1 }
   0x7   : > { %p151_p3 = scmp.ne.s32.totalorder %s1803_s19, %s1799_s18  ;;  %p152_p4 = scmp.eq.s32.totalorder %s1340_s23, 1 }
   0x8   : > { %s1882_s27 = scalar_select %p133_p1, %s1807_s20, %s135_s25  }
   0x9   : > { %p1884_p5 = por %p146_p2, %p145_p0  ;;  %p1888_p6 = por %p152_p4, %p151_p3 }
   0xa   : > { %p1343_p7 = scmp.ge.s32.totalorder %s1811_s21, 1  ;;  %p192_p8 = scmp.lt.s32.totalorder %s1811_s21, 3 }
   0xc   : > { %p193_p9 = pnand %p1343_p7, %p192_p8 }
   0xd   : > { %v1693_v0 = vld [vmem:[%s2310_s1 + $0x40] sm:$0xff] (!%p193_p9)   ;;  %v1697_v4 = vld [vmem:[%s2310_s1 + $0x48] sm:$0xff] (!%p193_p9)   ;;  %v1701_v8 = vld [vmem:[%s2310_s1 + $0x50] sm:$0xff] (!%p193_p9)   ;;  %s1345_s17 = sshll.u32 (!%p193_p9), %s1867_s22, 4  ;;  %s218_s15 = sand.u32 (!%p193_p9), 1, %s1803_s19  }
   0xe   : > { %196 = sbr.rel (%p193_p9) target bundleno = 621 (0x26d), region = 40  ;;  %v1694_v1 = vld [vmem:[%s2310_s1] sm:$0xff] (!%p193_p9)   ;;  %1411 = vmatprep.subr.bf16.mxu0 (!%p193_p9), %v1693_v0  ;;  %v1698_v5 = vld [vmem:[%s2310_s1 + $0x8] sm:$0xff] (!%p193_p9)   ;;  %v1702_v9 = vld [vmem:[%s2310_s1 + $0x10] sm:$0xff] (!%p193_p9)   ;;  %p222_p10 = scmp.lt.s32.totalorder (!%p193_p9), %s1345_s17, 31 }
   0xf   : > { %v1695_v2 = vld [vmem:[%s2310_s1 + $0xc0] sm:$0xff] (!%p193_p9)   ;;  %1412 = vmatpush3.bf16.msra.mxu0 (!%p193_p9), %v1694_v1  ;;  %v1699_v6 = vld [vmem:[%s2310_s1 + $0xc8] sm:$0xff] (!%p193_p9)   ;;  %v1703_v10 = vld [vmem:[%s2310_s1 + $0xd0] sm:$0xff] (!%p193_p9)   ;;  %s1344_s16 = sshll.u32 (!%p193_p9), %s218_s15, 7  ;;  %s1410_s25 = sshll.u32 (!%p193_p9), %s1867_s22, 11 }
  0x10   : > { %v1696_v3 = vld [vmem:[%s2310_s1 + $0x80] sm:$0xff] (!%p193_p9)   ;;  %1475 = vmatprep.subr.bf16.mxu1 (!%p193_p9), %v1695_v2  ;;  %1413 = vmatprep.subr.bf16.mxu0 (!%p193_p9), %v1697_v4  ;;  %v1700_v7 = vld [vmem:[%s2310_s1 + $0x88] sm:$0xff] (!%p193_p9)   ;;  %v1704_v11 = vld [vmem:[%s2310_s1 + $0x90] sm:$0xff] (!%p193_p9)   ;;  %s2259_s8 = scalar_lea.hbm (!%p193_p9), %s2314_s5, %s1410_s25  ;;  %s2268_s22 = scalar_lea.sflag (!%p193_p9), [#allocation3], %s218_s15 }
  0x11   : > { %1476 = vmatpush3.bf16.msra.mxu1 (!%p193_p9), %v1696_v3  ;;  %v1705_v12 = vld [vmem:[%s2310_s1 + $0x58] sm:$0xff] (!%p193_p9)   ;;  %v1709_v16 = vld [vmem:[%s2310_s1 + $0x60] sm:$0xff] (!%p193_p9)   ;;  %v1713_v20 = vld [vmem:[%s2310_s1 + $0x68] sm:$0xff] (!%p193_p9)   ;;  %s1813_s10 = smov (!%p193_p9), [#allocation2]  }
  0x12   : > { %1477 = vmatprep.subr.bf16.mxu1 (!%p193_p9), %v1699_v6  ;;  %v1706_v13 = vld [vmem:[%s2310_s1 + $0x18] sm:$0xff] (!%p193_p9)   ;;  %v1710_v17 = vld [vmem:[%s2310_s1 + $0x20] sm:$0xff] (!%p193_p9)   ;;  %v1714_v21 = vld [vmem:[%s2310_s1 + $0x28] sm:$0xff] (!%p193_p9)   ;;  %s1753_s11 = sshll.u32 (!%p193_p9), %s1813_s10, 4  ;;  %s1754_s11 = int_to_ptr.vmem [resolvable:$false] %s1753_s11 }
  0x13   : > { %1414 = vmatpush3.bf16.msra.mxu0 (!%p193_p9), %v1698_v5  ;;  %v1707_v14 = vld [vmem:[%s2310_s1 + $0xd8] sm:$0xff] (!%p193_p9)   ;;  %v1711_v18 = vld [vmem:[%s2310_s1 + $0xe0] sm:$0xff] (!%p193_p9)   ;;  %v1715_v22 = vld [vmem:[%s2310_s1 + $0xe8] sm:$0xff] (!%p193_p9)   ;;  %s1755_s12 = scalar_lea.vmem (!%p193_p9), %s1754_s11, 4096 }
  0x14   : > { %1415 = vmatprep.subr.bf16.mxu0 (!%p193_p9), %v1701_v8  ;;  %v1708_v15 = vld [vmem:[%s2310_s1 + $0x98] sm:$0xff] (!%p193_p9)   ;;  %v1712_v19 = vld [vmem:[%s2310_s1 + $0xa0] sm:$0xff] (!%p193_p9)   ;;  %v1716_v23 = vld [vmem:[%s2310_s1 + $0xa8] sm:$0xff] (!%p193_p9)  }
  0x15   : > { %1478 = vmatpush3.bf16.msra.mxu1 %v1700_v7  ;;  %s2322_s17 = smov (!%p222_p10, %s1345_s17), 31  ;;  %v1717_v24 = vld [vmem:[%s2310_s1 + $0x70] sm:$0xff]   ;;  %v1721_v28 = vld [vmem:[%s2310_s1 + $0x78] sm:$0xff]   ;;  %v1725_v38 = vld [vmem:[%s2310_s1 + $0x140] sm:$0xff]  }
  0x16   : > { %1479 = vmatprep.subr.bf16.mxu1 %v1703_v10  ;;  %s1651_s9 = smul.u32 48, %s2322_s17  ;;  %v1718_v25 = vld [vmem:[%s2310_s1 + $0x30] sm:$0xff]   ;;  %v1722_v29 = vld [vmem:[%s2310_s1 + $0x38] sm:$0xff]   ;;  %v1726_v42 = vld [vmem:[%s2310_s1 + $0x100] sm:$0xff]  }
  0x17   : > { %1416 = vmatpush3.bf16.msra.mxu0 %v1702_v9  ;;  %v1719_v26 = vld [vmem:[%s2310_s1 + $0xf0] sm:$0xff]   ;;  %v1723_v30 = vld [vmem:[%s2310_s1 + $0xf8] sm:$0xff]   ;;  %v1727_v51 = vld [vmem:[%s2310_s1 + $0x148] sm:$0xff]  }
  0x18   : > { %1417 = vmatprep.subr.bf16.mxu0 %v1705_v12  ;;  %v1720_v27 = vld [vmem:[%s2310_s1 + $0xb0] sm:$0xff]   ;;  %s1985_s26 = scalar_lea.vmem %s2309_s0, %s1651_s9  ;;  %v1724_v34 = vld [vmem:[%s2310_s1 + $0xb8] sm:$0xff]   ;;  %v1728_v56 = vld [vmem:[%s2310_s1 + $0x108] sm:$0xff]  }
  0x19   : > { %1480 = vmatpush3.bf16.msra.mxu1 %v1704_v11  ;;  %v231_v31 = vld [vmem:[%s1985_s26 + $0x8] sm:$0xff]  ;;  %v237_v32 = vld [vmem:[%s1985_s26 + $0x38] sm:$0xff]  ;;  %v230_v35 = vld [vmem:[%s1985_s26] sm:$0xff] }
  0x1a   : > { %1481 = vmatprep.subr.bf16.mxu1 %v1707_v14  ;;  %v327_v33 = vpack.c.bf16 %v237_v32, %v231_v31  ;;  %v236_v36 = vld [vmem:[%s1985_s26 + $0x30] sm:$0xff]  ;;  %v233_v39 = vld [vmem:[%s1985_s26 + $0x18] sm:$0xff]  ;;  %v239_v40 = vld [vmem:[%s1985_s26 + $0x48] sm:$0xff] }
  0x1b   : > { %1418 = vmatpush3.bf16.msra.mxu0 %v1706_v13  ;;  %v326_v37 = vpack.c.bf16 %v236_v36, %v230_v35  ;;  %v329_v41 = vpack.c.bf16 %v239_v40, %v233_v39  ;;  %v232_v43 = vld [vmem:[%s1985_s26 + $0x10] sm:$0xff]  ;;  %v238_v44 = vld [vmem:[%s1985_s26 + $0x40] sm:$0xff]  ;;  %v243_v45 = vld [vmem:[%s1985_s26 + $0x68] sm:$0xff] }
  0x1c   : > { %1419 = vmatprep.subr.bf16.mxu0 %v1709_v16  ;;  %797 = vmatprep.mubr.bf16.mxu0 %v327_v33  ;;  %v328_v46 = vpack.c.bf16 %v238_v44, %v232_v43  ;;  %v249_v47 = vld [vmem:[%s1985_s26 + $0x98] sm:$0xff]  ;;  %v242_v48 = vld [vmem:[%s1985_s26 + $0x60] sm:$0xff]  ;;  %v248_v49 = vld [vmem:[%s1985_s26 + $0x90] sm:$0xff] }
  0x1d   : > { %1482 = vmatpush3.bf16.msra.mxu1 %v1708_v15  ;;  %894 = vmatprep.mubr.bf16.mxu1 %v329_v41  ;;  %v333_v50 = vpack.c.bf16 %v249_v47, %v243_v45  ;;  %v245_v52 = vld [vmem:[%s1985_s26 + $0x78] sm:$0xff]  ;;  %v251_v53 = vld [vmem:[%s1985_s26 + $0xa8] sm:$0xff]  ;;  %v332_v54 = vpack.c.bf16 %v248_v49, %v242_v48  ;;  %v244_v57 = vld [vmem:[%s1985_s26 + $0x70] sm:$0xff] }
  0x1e   : > { %1483 = vmatprep.subr.bf16.mxu1 %v1711_v18  ;;  %v335_v55 = vpack.c.bf16 %v251_v53, %v245_v52  ;;  %v250_v58 = vld [vmem:[%s1985_s26 + $0xa0] sm:$0xff]  ;;  %v255_v59 = vld [vmem:[%s1985_s26 + $0xc8] sm:$0xff]  ;;  %v261_v60 = vld [vmem:[%s1985_s26 + $0xf8] sm:$0xff] }
  0x1f   : > { %1420 = vmatpush3.bf16.msra.mxu0 %v1710_v17  ;;  %v339_v61 = vpack.c.bf16 %v261_v60, %v255_v59  ;;  %v334_v62 = vpack.c.bf16 %v250_v58, %v244_v57  ;;  %v1729_v63 = vld [vmem:[%s2310_s1 + $0x150] sm:$0xff]   ;;  %v257_v0 = vld [vmem:[%s1985_s26 + $0xd8] sm:$0xff]  ;;  %v263_v1 = vld [vmem:[%s1985_s26 + $0x108] sm:$0xff] }
  0x20   : > { %1421 = vmatprep.subr.bf16.mxu0 %v1713_v20  ;;  %v254_v2 = vld [vmem:[%s1985_s26 + $0xc0] sm:$0xff]  ;;  %v260_v3 = vld [vmem:[%s1985_s26 + $0xf0] sm:$0xff]  ;;  %v341_v4 = vpack.c.bf16 %v263_v1, %v257_v0  ;;  %v267_v7 = vld [vmem:[%s1985_s26 + $0x128] sm:$0xff] }
  0x21   : > { %1484 = vmatpush3.bf16.msra.mxu1 %v1712_v19  ;;  %v1730_v5 = vld [vmem:[%s2310_s1 + $0x110] sm:$0xff]   ;;  %v273_v8 = vld [vmem:[%s1985_s26 + $0x158] sm:$0xff]  ;;  %v262_v9 = vld [vmem:[%s1985_s26 + $0x100] sm:$0xff]  ;;  %v338_v10 = vpack.c.bf16 %v260_v3, %v254_v2 }
  0x22   : > { %1485 = vmatprep.subr.bf16.mxu1 %v1715_v22  ;;  %v256_v6 = vld [vmem:[%s1985_s26 + $0xd0] sm:$0xff]  ;;  %v1731_v11 = vld [vmem:[%s2310_s1 + $0x158] sm:$0xff]   ;;  %v275_v13 = vld [vmem:[%s1985_s26 + $0x168] sm:$0xff]  ;;  %v345_v14 = vpack.c.bf16 %v273_v8, %v267_v7 }
  0x23   : > { %1422 = vmatpush3.bf16.msra.mxu0 %v1714_v21  ;;  %v269_v12 = vld [vmem:[%s1985_s26 + $0x138] sm:$0xff]  ;;  %v340_v16 = vpack.c.bf16 %v262_v9, %v256_v6  ;;  %v266_v17 = vld [vmem:[%s1985_s26 + $0x120] sm:$0xff]  ;;  %v272_v20 = vld [vmem:[%s1985_s26 + $0x150] sm:$0xff] }
  0x24   : > { %1423 = vmatprep.subr.bf16.mxu0 %v1717_v24  ;;  %v1732_v15 = vld [vmem:[%s2310_s1 + $0x118] sm:$0xff]   ;;  %v347_v18 = vpack.c.bf16 %v275_v13, %v269_v12  ;;  %v1733_v19 = vld [vmem:[%s2310_s1 + $0x160] sm:$0xff]   ;;  %v279_v21 = vld [vmem:[%s1985_s26 + $0x188] sm:$0xff] }
  0x25   : > { %1486 = vmatpush3.bf16.msra.mxu1 %v1716_v23  ;;  %v285_v22 = vld [vmem:[%s1985_s26 + $0x1b8] sm:$0xff]  ;;  %v1734_v23 = vld [vmem:[%s2310_s1 + $0x120] sm:$0xff]   ;;  %v268_v24 = vld [vmem:[%s1985_s26 + $0x130] sm:$0xff] }
  0x26   : > { %1487 = vmatprep.subr.bf16.mxu1 %v1719_v26  ;;  %v274_v26 = vld [vmem:[%s1985_s26 + $0x160] sm:$0xff]  ;;  %v1736_v32 = vld [vmem:[%s2310_s1 + $0x128] sm:$0xff]   ;;  %v284_v35 = vld [vmem:[%s1985_s26 + $0x1b0] sm:$0xff] }
  0x27   : > { %1424 = vmatpush3.bf16.msra.mxu0 %v1718_v25  ;;  %v344_v25 = vpack.c.bf16 %v272_v20, %v266_v17  ;;  %v346_v31 = vpack.c.bf16 %v274_v26, %v268_v24  ;;  %v278_v33 = vld [vmem:[%s1985_s26 + $0x180] sm:$0xff]  ;;  %v291_v36 = vld [vmem:[%s1985_s26 + $0x1e8] sm:$0xff]  ;;  %v1738_v39 = vld [vmem:[%s2310_s1 + $0x130] sm:$0xff]  }
  0x28   : > { %1425 = vmatprep.subr.bf16.mxu0 %v1721_v28  ;;  %v351_v28 = vpack.c.bf16 %v285_v22, %v279_v21  ;;  %v350_v40 = vpack.c.bf16 %v284_v35, %v278_v33  ;;  %v280_v41 = vld [vmem:[%s1985_s26 + $0x190] sm:$0xff]  ;;  %v293_v44 = vld [vmem:[%s1985_s26 + $0x1f8] sm:$0xff]  ;;  %v299_v45 = vld [vmem:[%s1985_s26 + $0x228] sm:$0xff] }
  0x29   : > { %1488 = vmatpush3.bf16.msra.mxu1 %v1720_v27  ;;  %v281_v27 = vld [vmem:[%s1985_s26 + $0x198] sm:$0xff]  ;;  %v359_v48 = vpack.c.bf16 %v299_v45, %v293_v44  ;;  %v303_v52 = vld [vmem:[%s1985_s26 + $0x248] sm:$0xff]  ;;  %v304_v0 = vld [vmem:[%s1985_s26 + $0x250] sm:$0xff] }
  0x2a   : > { %1489 = vmatprep.subr.bf16.mxu1 %v1723_v30  ;;  %v1735_v30 = vld [vmem:[%s2310_s1 + $0x168] sm:$0xff]   ;;  %v1740_v49 = vld [vmem:[%s2310_s1 + $0x138] sm:$0xff]   ;;  %v310_v3 = vld [vmem:[%s1985_s26 + $0x280] sm:$0xff] }
  0x2b   : > { %1426 = vmatpush3.bf16.msra.mxu0 %v1722_v29  ;;  %v287_v29 = vld [vmem:[%s1985_s26 + $0x1c8] sm:$0xff]  ;;  %v309_v53 = vld [vmem:[%s1985_s26 + $0x278] sm:$0xff]  ;;  %v364_v8 = vpack.c.bf16 %v310_v3, %v304_v0  ;;  %v240_v20 = vld [vmem:[%s1985_s26 + $0x50] sm:$0xff] }
  0x2c   : > { %1539 = vmatprep.subr.bf16.mxu0 %v1725_v38  ;;  %v1737_v38 = vld [vmem:[%s2310_s1 + $0x170] sm:$0xff]   ;;  %v363_v57 = vpack.c.bf16 %v309_v53, %v303_v52  ;;  %v305_v58 = vld [vmem:[%s1985_s26 + $0x258] sm:$0xff]  ;;  %v311_v59 = vld [vmem:[%s1985_s26 + $0x288] sm:$0xff] }
  0x2d   : > { %1490 = vmatpush3.bf16.msra.mxu1 %v1724_v34  ;;  %v353_v34 = vpack.c.bf16 %v287_v29, %v281_v27  ;;  %v315_v1 = vld [vmem:[%s1985_s26 + $0x2a8] sm:$0xff]  ;;  %v321_v2 = vld [vmem:[%s1985_s26 + $0x2d8] sm:$0xff]  ;;  %v252_v26 = vld [vmem:[%s1985_s26 + $0xb0] sm:$0xff] }
  0x2e   : > { %798 = vmatmul.mubr.bf16.vlgmr.msra.gmra.mrb[0].mxu0 %v326_v37  ;;  %v297_v37 = vld [vmem:[%s1985_s26 + $0x218] sm:$0xff]  ;;  %v369_v7 = vpack.c.bf16 %v321_v2, %v315_v1  ;;  %v235_v12 = vld [vmem:[%s1985_s26 + $0x28] sm:$0xff]  ;;  %v288_v44 = vld [vmem:[%s1985_s26 + $0x1d0] sm:$0xff] }
  0x2f   : > { %1540 = vmatpush3.bf16.msra.mxu0 %v1726_v42  ;;  %805 = vmatprep.mubr.bf16.mxu0 %v333_v50  ;;  %v286_v42 = vld [vmem:[%s1985_s26 + $0x1c0] sm:$0xff]  ;;  %v357_v43 = vpack.c.bf16 %v297_v37, %v291_v36  ;;  %v241_v13 = vld [vmem:[%s1985_s26 + $0x58] sm:$0xff]  ;;  %v247_v21 = vld [vmem:[%s1985_s26 + $0x88] sm:$0xff] }
  0x30   : > { %895 = vmatmul.mubr.bf16.vlgmr.msra.gmra.mrb[0].mxu1 %v328_v46  ;;  %1541 = vmatprep.subr.bf16.mxu0 %v1727_v51  ;;  %v1739_v46 = vld [vmem:[%s2310_s1 + $0x178] sm:$0xff]   ;;  %v352_v47 = vpack.c.bf16 %v286_v42, %v280_v41  ;;  %v290_v50 = vld [vmem:[%s1985_s26 + $0x1e0] sm:$0xff]  ;;  %v296_v51 = vld [vmem:[%s1985_s26 + $0x210] sm:$0xff]  ;;  %v331_v17 = vpack.c.bf16 %v241_v13, %v235_v12 }
  0x31   : > { %902 = vmatprep.mubr.bf16.mxu1 %v335_v55  ;;  %v292_v55 = vld [vmem:[%s1985_s26 + $0x1f0] sm:$0xff]  ;;  %v253_v22 = vld [vmem:[%s1985_s26 + $0xb8] sm:$0xff]  ;;  %v259_v27 = vld [vmem:[%s1985_s26 + $0xe8] sm:$0xff] }
  0x32   : > { %v337_v24 = vpack.c.bf16 %v253_v22, %v247_v21  ;;  %v271_v33 = vld [vmem:[%s1985_s26 + $0x148] sm:$0xff]  ;;  %v270_v37 = vld [vmem:[%s1985_s26 + $0x140] sm:$0xff]  ;;  %v313_v52 = vld [vmem:[%s1985_s26 + $0x298] sm:$0xff] }
  0x33   : > { %1542 = vmatpush3.bf16.msra.mxu0 %v1728_v56  ;;  %v298_v56 = vld [vmem:[%s1985_s26 + $0x220] sm:$0xff]  ;;  %v295_v45 = vld [vmem:[%s1985_s26 + $0x208] sm:$0xff]  ;;  %v1743_v2 = vld [vmem:[%s2312_s3 + $0x10] sm:$0xff]  }
  0x34   : > { %1543 = vmatprep.subr.bf16.mxu0 %v1729_v63  ;;  %v358_v60 = vpack.c.bf16 %v298_v56, %v292_v55  ;;  %v308_v63 = vld [vmem:[%s1985_s26 + $0x270] sm:$0xff]  ;;  %v306_v55 = vld [vmem:[%s1985_s26 + $0x260] sm:$0xff]  ;;  %v1742_v1 = vld [vmem:[%s2312_s3 + $0x8] sm:$0xff]  }
  0x35   : > { %v312_v56 = vld [vmem:[%s1985_s26 + $0x290] sm:$0xff]  ;;  %v1741_v0 = vld [vmem:[%s2312_s3] sm:$0xff]   ;;  %v1744_v3 = vld [vmem:[%s2312_s3 + $0x18] sm:$0xff]  }
  0x36   : > { %806 = vmatmul.mubr.bf16.gmra.mrb[4].mxu0 %v332_v54  ;;  %v356_v54 = vpack.c.bf16 %v296_v51, %v290_v50  ;;  %v300_v50 = vld [vmem:[%s1985_s26 + $0x230] sm:$0xff]  ;;  %v307_v51 = vld [vmem:[%s1985_s26 + $0x268] sm:$0xff]  ;;  %1619 = vmatprep.subr.bf16.mxu1 %v1741_v0 }
  0x37   : > { %813 = vmatprep.mubr.bf16.mxu0 %v339_v61  ;;  %1544 = vmatpush3.bf16.msra.mxu0 %v1730_v5  ;;  %v365_v61 = vpack.c.bf16 %v311_v59, %v305_v58  ;;  %v323_v5 = vld [vmem:[%s1985_s26 + $0x2e8] sm:$0xff]  ;;  %v325_v58 = vld [vmem:[%s1985_s26 + $0x2f8] sm:$0xff]  ;;  %v366_v59 = vpack.c.bf16 %v312_v56, %v306_v55 }
  0x38   : > { %903 = vmatmul.mubr.bf16.gmra.mrb[4].mxu1 %v334_v62  ;;  %1545 = vmatprep.subr.bf16.mxu0 %v1731_v11  ;;  %v302_v62 = vld [vmem:[%s1985_s26 + $0x240] sm:$0xff]  ;;  %v320_v11 = vld [vmem:[%s1985_s26 + $0x2d0] sm:$0xff] }
  0x39   : > { %910 = vmatprep.mubr.bf16.mxu1 %v341_v4  ;;  %v317_v4 = vld [vmem:[%s1985_s26 + $0x2b8] sm:$0xff]  ;;  %v362_v6 = vpack.c.bf16 %v308_v63, %v302_v62  ;;  %v324_v62 = vld [vmem:[%s1985_s26 + $0x2f0] sm:$0xff]  ;;  %1620 = vmatpush3.bf16.msra.mxu1 %v1741_v0 }
  0x3a   : > { %v371_v9 = vpack.c.bf16 %v323_v5, %v317_v4  ;;  %1621 = vmatprep.subr.bf16.mxu1 %v1742_v1  ;;  %v1745_v4 = vld [vmem:[%s2312_s3 + $0x20] sm:$0xff]   ;;  %v1746_v5 = vld [vmem:[%s2312_s3 + $0x28] sm:$0xff]  }
  0x3b   : > { %1546 = vmatpush3.bf16.msra.mxu0 %v1732_v15  ;;  %v316_v15 = vld [vmem:[%s1985_s26 + $0x2b0] sm:$0xff] }
  0x3c   : > { %1547 = vmatprep.subr.bf16.mxu0 %v1733_v19  ;;  %v234_v19 = vld [vmem:[%s1985_s26 + $0x20] sm:$0xff] }
  0x3d   : > { %1622 = vmatpush3.bf16.msra.mxu1 %v1742_v1 }
  0x3e   : > { %814 = vmatmul.mubr.bf16.gmra.mrb[8].mxu0 %v338_v10  ;;  %v314_v10 = vld [vmem:[%s1985_s26 + $0x2a0] sm:$0xff]  ;;  %1623 = vmatprep.subr.bf16.mxu1 %v1743_v2 }
  0x3f   : > { %821 = vmatprep.mubr.bf16.mxu0 %v345_v14  ;;  %1548 = vmatpush3.bf16.msra.mxu0 %v1734_v23  ;;  %v368_v14 = vpack.c.bf16 %v320_v11, %v314_v10  ;;  %v330_v23 = vpack.c.bf16 %v240_v20, %v234_v19 }
  0x40   : > { %911 = vmatmul.mubr.bf16.gmra.mrb[8].mxu1 %v340_v16  ;;  %1549 = vmatprep.subr.bf16.mxu0 %v1735_v30  ;;  %v322_v16 = vld [vmem:[%s1985_s26 + $0x2e0] sm:$0xff] }
  0x41   : > { %918 = vmatprep.mubr.bf16.mxu1 %v347_v18  ;;  %v370_v18 = vpack.c.bf16 %v322_v16, %v316_v15  ;;  %1624 = vmatpush3.bf16.msra.mxu1 %v1743_v2 }
  0x42   : > { %1625 = vmatprep.subr.bf16.mxu1 %v1744_v3 }
  0x43   : > { %1550 = vmatpush3.bf16.msra.mxu0 %v1736_v32  ;;  %v264_v32 = vld [vmem:[%s1985_s26 + $0x110] sm:$0xff] }
  0x44   : > { %1551 = vmatprep.subr.bf16.mxu0 %v1737_v38  ;;  %v276_v38 = vld [vmem:[%s1985_s26 + $0x170] sm:$0xff] }
  0x45   : > { %v348_v41 = vpack.c.bf16 %v276_v38, %v270_v37  ;;  %1626 = vmatpush3.bf16.msra.mxu1 %v1744_v3 }
  0x46   : > { %822 = vmatmul.mubr.bf16.gmra.mrb[12].mxu0 %v344_v25  ;;  %v246_v25 = vld [vmem:[%s1985_s26 + $0x80] sm:$0xff]  ;;  %1627 = vmatprep.subr.bf16.mxu1 %v1745_v4 }
  0x47   : > { %829 = vmatprep.mubr.bf16.mxu0 %v351_v28  ;;  %1552 = vmatpush3.bf16.msra.mxu0 %v1738_v39  ;;  %v265_v28 = vld [vmem:[%s1985_s26 + $0x118] sm:$0xff]  ;;  %v336_v29 = vpack.c.bf16 %v252_v26, %v246_v25  ;;  %v283_v39 = vld [vmem:[%s1985_s26 + $0x1a8] sm:$0xff] }
  0x48   : > { %919 = vmatmul.mubr.bf16.gmra.mrb[12].mxu1 %v346_v31  ;;  %1553 = vmatprep.subr.bf16.mxu0 %v1739_v46  ;;  %v343_v30 = vpack.c.bf16 %v265_v28, %v259_v27  ;;  %v258_v31 = vld [vmem:[%s1985_s26 + $0xe0] sm:$0xff]  ;;  %v301_v46 = vld [vmem:[%s1985_s26 + $0x238] sm:$0xff] }
  0x49   : > { %926 = vmatprep.mubr.bf16.mxu1 %v353_v34  ;;  %v277_v34 = vld [vmem:[%s1985_s26 + $0x178] sm:$0xff]  ;;  %v342_v35 = vpack.c.bf16 %v264_v32, %v258_v31  ;;  %1628 = vmatpush3.bf16.msra.mxu1 %v1745_v4 }
  0x4a   : > { %v349_v36 = vpack.c.bf16 %v277_v34, %v271_v33  ;;  %1629 = vmatprep.subr.bf16.mxu1 %v1746_v5 }
  0x4b   : > { %1554 = vmatpush3.bf16.msra.mxu0 %v1740_v49  ;;  %v294_v49 = vld [vmem:[%s1985_s26 + $0x200] sm:$0xff] }
  0x4c   : > { %v360_v53 = vpack.c.bf16 %v300_v50, %v294_v49 }
  0x4d   : > { %1630 = vmatpush3.bf16.msra.mxu1 %v1746_v5 }
  0x4e   : > { %830 = vmatmul.mubr.bf16.gmra.mrb[16].mxu0 %v350_v40  ;;  %v289_v40 = vld [vmem:[%s1985_s26 + $0x1d8] sm:$0xff] }
  0x4f   : > { %837 = vmatprep.mubr.bf16.mxu0 %v357_v43  ;;  %v355_v42 = vpack.c.bf16 %v289_v40, %v283_v39  ;;  %v282_v43 = vld [vmem:[%s1985_s26 + $0x1a0] sm:$0xff] }
  0x50   : > { %927 = vmatmul.mubr.bf16.gmra.mrb[16].mxu1 %v352_v47  ;;  %v354_v47 = vpack.c.bf16 %v288_v44, %v282_v43 }
  0x51   : > { %934 = vmatprep.mubr.bf16.mxu1 %v359_v48  ;;  %v361_v48 = vpack.c.bf16 %v301_v46, %v295_v45 }
  0x56   : > { %838 = vmatmul.mubr.bf16.gmra.mrb[20].mxu0 %v356_v54  ;;  %v367_v54 = vpack.c.bf16 %v313_v52, %v307_v51 }
  0x57   : > { %845 = vmatprep.mubr.bf16.mxu0 %v363_v57  ;;  %v319_v57 = vld [vmem:[%s1985_s26 + $0x2c8] sm:$0xff] }
  0x58   : > { %935 = vmatmul.mubr.bf16.gmra.mrb[20].mxu1 %v358_v60  ;;  %v373_v60 = vpack.c.bf16 %v325_v58, %v319_v57 }
  0x59   : > { %942 = vmatprep.mubr.bf16.mxu1 %v365_v61  ;;  %v318_v61 = vld [vmem:[%s1985_s26 + $0x2c0] sm:$0xff]  ;;  %s2239_s26 = scalar_lea.vmem [#allocation2], %s1344_s16 }
  0x5a   : > { %v372_v63 = vpack.c.bf16 %v324_v62, %v318_v61  ;;  %s1278_s30 = sshll.u32 %s2239_s26, 4  ;;  %s2261_s30 = int_to_ptr.vmem [resolvable:$true] %s1278_s30 }
  0x5b   : > { %s1749_s9 = scalar_lea.vmem %s2261_s30, 2048  ;;  %p1756_p0 = scmp.lt.s32.totalorder %s2261_s30, %s1754_s11 }
  0x5c   : > { %p1750_p11 = scmp.ne.s32.totalorder %s2261_s30, %s1749_s9  ;;  %p1757_p1 = scmp.lt.s32.totalorder %s1755_s12, %s1749_s9 }
  0x5e   : > { %846 = vmatmul.mubr.bf16.gmra.mrb[24].mxu0 %v362_v6  ;;  %v1747_v6 = vld [vmem:[%s2312_s3 + $0x30] sm:$0xff]   ;;  %p1751_p12 = pnand %p1750_p11, %p1884_p5  ;;  %p1758_p2 = por %p1757_p1, %p1756_p0 }
  0x5f   : > { %853 = vmatprep.mubr.bf16.mxu0 %v369_v7  ;;  %1631 = vmatprep.subr.bf16.mxu1 %v1747_v6  ;;  %v1748_v7 = vld [vmem:[%s2312_s3 + $0x38] sm:$0xff]  }
  0x60   : > { %943 = vmatmul.mubr.bf16.gmra.mrb[24].mxu1 %v364_v8  ;;  %p1752_p13 = pneg %p1751_p12 }
  0x61   : > { %950 = vmatprep.mubr.bf16.mxu1 %v371_v9  ;;  %1632 = vmatpush3.bf16.msra.mxu1 %v1747_v6  ;;  %v2167_v9 = vld [vmem:[%s2311_s2] ss:$0 sm:$0xff] }
  0x62   : > { %1633 = vmatprep.subr.bf16.mxu1 %v1748_v7  ;;  %p1759_p3 = pnand %p1758_p2, %p1752_p13 }
  0x65   : > { %1634 = vmatpush3.bf16.msra.mxu1 %v1748_v7 }
  0x66   : > { %854 = vmatmul.mubr.bf16.gmra.mrb[28].mxu0 %v368_v14 }
  0x67   : > { %991 = vmatprep.mubr.bf16.mxu0 %v331_v17 }
  0x68   : > { %951 = vmatmul.mubr.bf16.gmra.mrb[28].mxu1 %v370_v18 }
  0x6e   : > { %992 = vmatmul.mubr.bf16.vlgmr.msra.gmra.mrb[32].mxu0 %v330_v23 }
  0x6f   : > { %999 = vmatprep.mubr.bf16.mxu0 %v337_v24 }
  0x76   : > { %1000 = vmatmul.mubr.bf16.gmra.mrb[36].mxu0 %v336_v29 }
  0x77   : > { %1007 = vmatprep.mubr.bf16.mxu0 %v343_v30 }
  0x7e   : > { %1008 = vmatmul.mubr.bf16.gmra.mrb[40].mxu0 %v342_v35 }
  0x7f   : > { %1015 = vmatprep.mubr.bf16.mxu0 %v349_v36 }
  0x86   : > { %1016 = vmatmul.mubr.bf16.gmra.mrb[44].mxu0 %v348_v41 }
  0x87   : > { %1023 = vmatprep.mubr.bf16.mxu0 %v355_v42 }
  0x8e   : > { %1024 = vmatmul.mubr.bf16.gmra.mrb[48].mxu0 %v354_v47 }
  0x8f   : > { %1031 = vmatprep.mubr.bf16.mxu0 %v361_v48 }
  0x96   : > { %1032 = vmatmul.mubr.bf16.gmra.mrb[52].mxu0 %v360_v53 }
  0x97   : > { %1039 = vmatprep.mubr.bf16.mxu0 %v367_v54 }
  0x9e   : > { %1040 = vmatmul.mubr.bf16.gmra.mrb[56].mxu0 %v366_v59 }
  0x9f   : > { %1047 = vmatprep.mubr.bf16.mxu0 %v373_v60 }
  0xa6   : > { %1048 = vmatmul.mubr.bf16.gmra.mrb[60].mxu0 %v372_v63 }
 0x101   : > { %v1427_v8 = vpop.f32.mrb[0].mxu0 }
 0x102   : > { %v1428_v10 = vpop.f32.mrb[1].mxu0 }
 0x103   : > { %v1429_v11 = vadd.f32 %v1428_v10, %v1427_v8  ;;  %v1430_v12 = vpop.f32.mrb[2].mxu0  ;;  %v1491_v13 = vpop.f32.mrb[0].mxu1 }
 0x104   : > { %v1431_v14 = vpop.f32.mrb[3].mxu0  ;;  %v1492_v17 = vpop.f32.mrb[1].mxu1 }
 0x105   : > { %v800_v15 = vadd.f32 %v1429_v11, %v2167_v9  ;;  %v1432_v16 = vadd.f32 %v1431_v14, %v1430_v12  ;;  %v1493_v18 = vadd.f32 %v1492_v17, %v1491_v13  ;;  %v1494_v19 = vpop.f32.mrb[2].mxu1 }
 0x106   : > { %v1495_v21 = vpop.f32.mrb[3].mxu1 }
 0x107   : > { %v803_v20 = vadd.f32 %v1432_v16, %v2167_v9  ;;  %v2171_v22 = vadd.f32 %v1493_v18, %v800_v15  ;;  %v1496_v23 = vadd.f32 %v1495_v21, %v1494_v19 }
 0x109   : > { %v1433_v24 = vpop.f32.mrb[4].mxu0  ;;  %v2173_v25 = vadd.f32 %v1496_v23, %v803_v20 }
 0x10a   : > { %v1434_v26 = vpop.f32.mrb[5].mxu0 }
 0x10b   : > { %v1435_v27 = vadd.f32 %v1434_v26, %v1433_v24  ;;  %v1436_v28 = vpop.f32.mrb[6].mxu0  ;;  %v1497_v29 = vpop.f32.mrb[4].mxu1 }
 0x10c   : > { %v1437_v30 = vpop.f32.mrb[7].mxu0  ;;  %v1498_v33 = vpop.f32.mrb[5].mxu1 }
 0x10d   : > { %v808_v31 = vadd.f32 %v1435_v27, %v2167_v9  ;;  %v1438_v32 = vadd.f32 %v1437_v30, %v1436_v28  ;;  %v1499_v34 = vadd.f32 %v1498_v33, %v1497_v29  ;;  %v1500_v35 = vpop.f32.mrb[6].mxu1 }
 0x10e   : > { %v1501_v37 = vpop.f32.mrb[7].mxu1 }
 0x10f   : > { %v811_v36 = vadd.f32 %v1438_v32, %v2167_v9  ;;  %v2177_v38 = vadd.f32 %v1499_v34, %v808_v31  ;;  %v1502_v39 = vadd.f32 %v1501_v37, %v1500_v35 }
 0x111   : > { %v1439_v40 = vpop.f32.mrb[8].mxu0  ;;  %v2179_v41 = vadd.f32 %v1502_v39, %v811_v36 }
 0x112   : > { %v1440_v42 = vpop.f32.mrb[9].mxu0 }
 0x113   : > { %v1441_v43 = vadd.f32 %v1440_v42, %v1439_v40  ;;  %v1442_v44 = vpop.f32.mrb[10].mxu0  ;;  %v1503_v45 = vpop.f32.mrb[8].mxu1 }
 0x114   : > { %v1443_v46 = vpop.f32.mrb[11].mxu0  ;;  %v1504_v49 = vpop.f32.mrb[9].mxu1 }
 0x115   : > { %v816_v47 = vadd.f32 %v1441_v43, %v2167_v9  ;;  %v1444_v48 = vadd.f32 %v1443_v46, %v1442_v44  ;;  %v1505_v50 = vadd.f32 %v1504_v49, %v1503_v45  ;;  %v1506_v51 = vpop.f32.mrb[10].mxu1 }
 0x116   : > { %v1507_v53 = vpop.f32.mrb[11].mxu1 }
 0x117   : > { %v819_v52 = vadd.f32 %v1444_v48, %v2167_v9  ;;  %v2183_v54 = vadd.f32 %v1505_v50, %v816_v47  ;;  %v1508_v55 = vadd.f32 %v1507_v53, %v1506_v51 }
 0x119   : > { %v1445_v56 = vpop.f32.mrb[12].mxu0  ;;  %v2185_v57 = vadd.f32 %v1508_v55, %v819_v52 }
 0x11a   : > { %v1446_v58 = vpop.f32.mrb[13].mxu0 }
 0x11b   : > { %v1447_v59 = vadd.f32 %v1446_v58, %v1445_v56  ;;  %v1448_v60 = vpop.f32.mrb[14].mxu0  ;;  %v1509_v61 = vpop.f32.mrb[12].mxu1 }
 0x11c   : > { %v1449_v62 = vpop.f32.mrb[15].mxu0  ;;  %v1510_v1 = vpop.f32.mrb[13].mxu1 }
 0x11d   : > { %v824_v63 = vadd.f32 %v1447_v59, %v2167_v9  ;;  %v1450_v0 = vadd.f32 %v1449_v62, %v1448_v60  ;;  %v1511_v2 = vadd.f32 %v1510_v1, %v1509_v61  ;;  %v1512_v3 = vpop.f32.mrb[14].mxu1 }
 0x11e   : > { %v1513_v5 = vpop.f32.mrb[15].mxu1 }
 0x11f   : > { %v827_v4 = vadd.f32 %v1450_v0, %v2167_v9  ;;  %v2189_v6 = vadd.f32 %v1511_v2, %v824_v63  ;;  %v1514_v7 = vadd.f32 %v1513_v5, %v1512_v3 }
 0x121   : > { %v1451_v8 = vpop.f32.mrb[16].mxu0  ;;  %v2191_v10 = vadd.f32 %v1514_v7, %v827_v4 }
 0x122   : > { %v1452_v11 = vpop.f32.mrb[17].mxu0 }
 0x123   : > { %v1453_v12 = vadd.f32 %v1452_v11, %v1451_v8  ;;  %v1454_v13 = vpop.f32.mrb[18].mxu0  ;;  %v1515_v14 = vpop.f32.mrb[16].mxu1 }
 0x124   : > { %v1455_v15 = vpop.f32.mrb[19].mxu0  ;;  %v1516_v18 = vpop.f32.mrb[17].mxu1 }
 0x125   : > { %v832_v16 = vadd.f32 %v1453_v12, %v2167_v9  ;;  %v1456_v17 = vadd.f32 %v1455_v15, %v1454_v13  ;;  %v1517_v19 = vadd.f32 %v1516_v18, %v1515_v14  ;;  %v1518_v20 = vpop.f32.mrb[18].mxu1 }
 0x126   : > { %v1519_v23 = vpop.f32.mrb[19].mxu1 }
 0x127   : > { %v835_v21 = vadd.f32 %v1456_v17, %v2167_v9  ;;  %v2195_v24 = vadd.f32 %v1517_v19, %v832_v16  ;;  %v1520_v26 = vadd.f32 %v1519_v23, %v1518_v20 }
 0x129   : > { %v1457_v27 = vpop.f32.mrb[20].mxu0  ;;  %v2197_v28 = vadd.f32 %v1520_v26, %v835_v21 }
 0x12a   : > { %v1458_v29 = vpop.f32.mrb[21].mxu0 }
 0x12b   : > { %v1459_v30 = vadd.f32 %v1458_v29, %v1457_v27  ;;  %v1460_v31 = vpop.f32.mrb[22].mxu0  ;;  %v1521_v32 = vpop.f32.mrb[20].mxu1 }
 0x12c   : > { %v1461_v33 = vpop.f32.mrb[23].mxu0  ;;  %v1522_v36 = vpop.f32.mrb[21].mxu1 }
 0x12d   : > { %v840_v34 = vadd.f32 %v1459_v30, %v2167_v9  ;;  %v1462_v35 = vadd.f32 %v1461_v33, %v1460_v31  ;;  %v1523_v37 = vadd.f32 %v1522_v36, %v1521_v32  ;;  %v1524_v39 = vpop.f32.mrb[22].mxu1 }
 0x12e   : > { %v1525_v42 = vpop.f32.mrb[23].mxu1 }
 0x12f   : > { %v843_v40 = vadd.f32 %v1462_v35, %v2167_v9  ;;  %v2201_v43 = vadd.f32 %v1523_v37, %v840_v34  ;;  %v1526_v44 = vadd.f32 %v1525_v42, %v1524_v39 }
 0x131   : > { %v1463_v45 = vpop.f32.mrb[24].mxu0  ;;  %v2203_v46 = vadd.f32 %v1526_v44, %v843_v40 }
 0x132   : > { %v1464_v47 = vpop.f32.mrb[25].mxu0 }
 0x133   : > { %v1465_v48 = vadd.f32 %v1464_v47, %v1463_v45  ;;  %v1466_v49 = vpop.f32.mrb[26].mxu0  ;;  %v1527_v50 = vpop.f32.mrb[24].mxu1 }
 0x134   : > { %v1467_v51 = vpop.f32.mrb[27].mxu0  ;;  %v1528_v55 = vpop.f32.mrb[25].mxu1 }
 0x135   : > { %v848_v52 = vadd.f32 %v1465_v48, %v2167_v9  ;;  %v1468_v53 = vadd.f32 %v1467_v51, %v1466_v49  ;;  %v1529_v56 = vadd.f32 %v1528_v55, %v1527_v50  ;;  %v1530_v58 = vpop.f32.mrb[26].mxu1 }
 0x136   : > { %v1531_v60 = vpop.f32.mrb[27].mxu1 }
 0x137   : > { %v851_v59 = vadd.f32 %v1468_v53, %v2167_v9  ;;  %v2207_v61 = vadd.f32 %v1529_v56, %v848_v52  ;;  %v1532_v62 = vadd.f32 %v1531_v60, %v1530_v58 }
 0x139   : > { %v1469_v63 = vpop.f32.mrb[28].mxu0  ;;  %v2209_v0 = vadd.f32 %v1532_v62, %v851_v59 }
 0x13a   : > { %v1470_v1 = vpop.f32.mrb[29].mxu0 }
 0x13b   : > { %v1471_v2 = vadd.f32 %v1470_v1, %v1469_v63  ;;  %v1472_v3 = vpop.f32.mrb[30].mxu0  ;;  %v1533_v4 = vpop.f32.mrb[28].mxu1 }
 0x13c   : > { %v1473_v5 = vpop.f32.mrb[31].mxu0  ;;  %v1534_v11 = vpop.f32.mrb[29].mxu1 }
 0x13d   : > { %v856_v7 = vadd.f32 %v1471_v2, %v2167_v9  ;;  %v1474_v8 = vadd.f32 %v1473_v5, %v1472_v3  ;;  %v1535_v12 = vadd.f32 %v1534_v11, %v1533_v4  ;;  %v1536_v13 = vpop.f32.mrb[30].mxu1 }
 0x13e   : > { %v1537_v15 = vpop.f32.mrb[31].mxu1 }
 0x13f   : > { %v859_v14 = vadd.f32 %v1474_v8, %v2167_v9  ;;  %v2213_v16 = vadd.f32 %v1535_v12, %v856_v7  ;;  %v1538_v17 = vadd.f32 %v1537_v15, %v1536_v13 }
 0x141   : > { %v1555_v18 = vpop.f32.mrb[32].mxu0  ;;  %v2215_v19 = vadd.f32 %v1538_v17, %v859_v14 }
 0x142   : > { %v1556_v20 = vpop.f32.mrb[33].mxu0 }
 0x143   : > { %v1557_v21 = vadd.f32 %v1556_v20, %v1555_v18  ;;  %v1558_v23 = vpop.f32.mrb[34].mxu0 }
 0x144   : > { %v1559_v26 = vpop.f32.mrb[35].mxu0 }
 0x145   : > { %v994_v27 = vadd.f32 %v1557_v21, %v2171_v22  ;;  %v1560_v29 = vadd.f32 %v1559_v26, %v1558_v23 }
 0x147   : > { %v997_v30 = vadd.f32 %v1560_v29, %v2173_v25  ;;  %v1056_v31 = vmax.f32 %v994_v27, 0.0 }
 0x149   : > { %v1057_v32 = vmax.f32 %v997_v30, 0.0  ;;  %v1561_v33 = vpop.f32.mrb[36].mxu0 }
 0x14a   : > { %v1562_v9 = vpop.f32.mrb[37].mxu0 }
 0x14b   : > { %v1563_v34 = vadd.f32 %v1562_v9, %v1561_v33  ;;  %v1564_v35 = vpop.f32.mrb[38].mxu0  ;;  %v1072_v36 = vpack.c.bf16 %v1057_v32, %v1056_v31 }
 0x14c   : > { %v1565_v37 = vpop.f32.mrb[39].mxu0 }
 0x14d   : > { %v1002_v39 = vadd.f32 %v1563_v34, %v2177_v38  ;;  %v1566_v40 = vadd.f32 %v1565_v37, %v1564_v35  ;;  %1635 = vmatprep.mubr.bf16.mxu1 %v1072_v36 }
 0x14f   : > { %v1005_v42 = vadd.f32 %v1566_v40, %v2179_v41  ;;  %v1058_v44 = vmax.f32 %v1002_v39, 0.0 }
 0x151   : > { %v1059_v45 = vmax.f32 %v1005_v42, 0.0  ;;  %v1567_v22 = vpop.f32.mrb[40].mxu0 }
 0x152   : > { %v1568_v47 = vpop.f32.mrb[41].mxu0 }
 0x153   : > { %v1073_v48 = vpack.c.bf16 %v1059_v45, %v1058_v44  ;;  %v1569_v25 = vadd.f32 %v1568_v47, %v1567_v22  ;;  %v1570_v49 = vpop.f32.mrb[42].mxu0 }
 0x154   : > { %v1571_v50 = vpop.f32.mrb[43].mxu0 }
 0x155   : > { %v1010_v51 = vadd.f32 %v1569_v25, %v2183_v54  ;;  %v1572_v52 = vadd.f32 %v1571_v50, %v1570_v49  ;;  %1636 = vmatmul.mubr.bf16.vlgmr.msra.gmra.mrb[32].mxu1 %v1073_v48 }
 0x157   : > { %v1013_v53 = vadd.f32 %v1572_v52, %v2185_v57  ;;  %v1060_v55 = vmax.f32 %v1010_v51, 0.0 }
 0x159   : > { %v1061_v38 = vmax.f32 %v1013_v53, 0.0  ;;  %v1573_v56 = vpop.f32.mrb[44].mxu0 }
 0x15a   : > { %v1574_v58 = vpop.f32.mrb[45].mxu0 }
 0x15b   : > { %v1575_v59 = vadd.f32 %v1574_v58, %v1573_v56  ;;  %v1576_v41 = vpop.f32.mrb[46].mxu0  ;;  %v1074_v60 = vpack.c.bf16 %v1061_v38, %v1060_v55 }
 0x15c   : > { %v1577_v62 = vpop.f32.mrb[47].mxu0 }
 0x15d   : > { %v1018_v63 = vadd.f32 %v1575_v59, %v2189_v6  ;;  %v1578_v1 = vadd.f32 %v1577_v62, %v1576_v41  ;;  %1639 = vmatprep.mubr.bf16.mxu1 %v1074_v60 }
 0x15f   : > { %v1021_v2 = vadd.f32 %v1578_v1, %v2191_v10  ;;  %v1062_v3 = vmax.f32 %v1018_v63, 0.0 }
 0x161   : > { %v1063_v54 = vmax.f32 %v1021_v2, 0.0  ;;  %v1579_v4 = vpop.f32.mrb[48].mxu0 }
 0x162   : > { %v1580_v5 = vpop.f32.mrb[49].mxu0 }
 0x163   : > { %v1581_v7 = vadd.f32 %v1580_v5, %v1579_v4  ;;  %v1582_v57 = vpop.f32.mrb[50].mxu0  ;;  %v1075_v8 = vpack.c.bf16 %v1063_v54, %v1062_v3 }
 0x164   : > { %v1583_v11 = vpop.f32.mrb[51].mxu0 }
 0x165   : > { %v1026_v12 = vadd.f32 %v1581_v7, %v2195_v24  ;;  %v1584_v13 = vadd.f32 %v1583_v11, %v1582_v57  ;;  %1640 = vmatmul.mubr.bf16.gmra.mrb[36].mxu1 %v1075_v8 }
 0x167   : > { %v1029_v14 = vadd.f32 %v1584_v13, %v2197_v28  ;;  %v1064_v15 = vmax.f32 %v1026_v12, 0.0 }
 0x169   : > { %v1065_v6 = vmax.f32 %v1029_v14, 0.0  ;;  %v1585_v17 = vpop.f32.mrb[52].mxu0 }
 0x16a   : > { %v1586_v18 = vpop.f32.mrb[53].mxu0 }
 0x16b   : > { %v1587_v20 = vadd.f32 %v1586_v18, %v1585_v17  ;;  %v1588_v10 = vpop.f32.mrb[54].mxu0  ;;  %v1076_v21 = vpack.c.bf16 %v1065_v6, %v1064_v15 }
 0x16c   : > { %v1589_v23 = vpop.f32.mrb[55].mxu0 }
 0x16d   : > { %v1034_v26 = vadd.f32 %v1587_v20, %v2201_v43  ;;  %v1590_v27 = vadd.f32 %v1589_v23, %v1588_v10  ;;  %1643 = vmatprep.mubr.bf16.mxu1 %v1076_v21 }
 0x16f   : > { %v1037_v29 = vadd.f32 %v1590_v27, %v2203_v46  ;;  %v1066_v30 = vmax.f32 %v1034_v26, 0.0 }
 0x171   : > { %v1067_v24 = vmax.f32 %v1037_v29, 0.0  ;;  %v1591_v31 = vpop.f32.mrb[56].mxu0 }
 0x172   : > { %v1592_v32 = vpop.f32.mrb[57].mxu0 }
 0x173   : > { %v1593_v33 = vadd.f32 %v1592_v32, %v1591_v31  ;;  %v1594_v28 = vpop.f32.mrb[58].mxu0  ;;  %v1077_v9 = vpack.c.bf16 %v1067_v24, %v1066_v30 }
 0x174   : > { %v1595_v34 = vpop.f32.mrb[59].mxu0 }
 0x175   : > { %v1042_v35 = vadd.f32 %v1593_v33, %v2207_v61  ;;  %v1596_v36 = vadd.f32 %v1595_v34, %v1594_v28  ;;  %1644 = vmatmul.mubr.bf16.gmra.mrb[40].mxu1 %v1077_v9 }
 0x177   : > { %v1045_v37 = vadd.f32 %v1596_v36, %v2209_v0  ;;  %v1068_v39 = vmax.f32 %v1042_v35, 0.0  ;;  %v1396_v0 = vld [vmem:[%s2313_s4] ss:$0 sm:$0xff] }
 0x179   : > { %v1069_v43 = vmax.f32 %v1045_v37, 0.0  ;;  %v1597_v40 = vpop.f32.mrb[60].mxu0 }
 0x17a   : > { %v1598_v46 = vpop.f32.mrb[61].mxu0 }
 0x17b   : > { %v1599_v42 = vadd.f32 %v1598_v46, %v1597_v40  ;;  %v1600_v44 = vpop.f32.mrb[62].mxu0  ;;  %v1078_v45 = vpack.c.bf16 %v1069_v43, %v1068_v39 }
 0x17c   : > { %v1601_v22 = vpop.f32.mrb[63].mxu0 }
 0x17d   : > { %v1050_v47 = vadd.f32 %v1599_v42, %v2213_v16  ;;  %v1602_v48 = vadd.f32 %v1601_v22, %v1600_v44  ;;  %1647 = vmatprep.mubr.bf16.mxu1 %v1078_v45 }
 0x17f   : > { %v1053_v61 = vadd.f32 %v1602_v48, %v2215_v19  ;;  %v1070_v25 = vmax.f32 %v1050_v47, 0.0 }
 0x181   : > { %v1071_v49 = vmax.f32 %v1053_v61, 0.0 }
 0x183   : > { %v1079_v50 = vpack.c.bf16 %v1071_v49, %v1070_v25 }
 0x185   : > { %1648 = vmatmul.mubr.bf16.gmra.mrb[44].mxu1 %v1079_v50 }
 0x228   : > { %v1637_v51 = vpop.f32.mrb[32].mxu1 }
 0x229   : > { %v1194_v52 = vadd.f32 %v1637_v51, %v1396_v0  ;;  %v1185_v53 = vpop.f32.mrb[33].mxu1 }
 0x22a   : > { %v1186_v55 = vadd.f32 %v1396_v0, %v1185_v53  ;;  %v1638_v16 = vpop.f32.mrb[34].mxu1 }
 0x22b   : > { %1250 = vst [vmem:[%s2239_s26 + $0x10] sm:$0xff] %v1194_v52  ;;  %v1197_v19 = vadd.f32 %v1638_v16, %v1396_v0  ;;  %v1188_v38 = vpop.f32.mrb[35].mxu1 }
 0x22c   : > { %1248 = vst [vmem:[%s2239_s26] sm:$0xff] %v1186_v55  ;;  %v1189_v56 = vadd.f32 %v1396_v0, %v1188_v38 }
 0x22d   : > { %1251 = vst [vmem:[%s2239_s26 + $0x18] sm:$0xff] %v1197_v19 }
 0x22e   : > { %1249 = vst [vmem:[%s2239_s26 + $0x8] sm:$0xff] %v1189_v56 }
 0x238   : > { %v1641_v58 = vpop.f32.mrb[36].mxu1 }
 0x239   : > { %v1210_v59 = vadd.f32 %v1641_v58, %v1396_v0  ;;  %v1201_v41 = vpop.f32.mrb[37].mxu1 }
 0x23a   : > { %v1202_v60 = vadd.f32 %v1396_v0, %v1201_v41  ;;  %v1642_v62 = vpop.f32.mrb[38].mxu1 }
 0x23b   : > { %1254 = vst [vmem:[%s2239_s26 + $0x30] sm:$0xff] %v1210_v59  ;;  %v1213_v63 = vadd.f32 %v1642_v62, %v1396_v0  ;;  %v1204_v1 = vpop.f32.mrb[39].mxu1 }
 0x23c   : > { %1252 = vst [vmem:[%s2239_s26 + $0x20] sm:$0xff] %v1202_v60  ;;  %v1205_v2 = vadd.f32 %v1396_v0, %v1204_v1 }
 0x23d   : > { %1255 = vst [vmem:[%s2239_s26 + $0x38] sm:$0xff] %v1213_v63 }
 0x23e   : > { %1253 = vst [vmem:[%s2239_s26 + $0x28] sm:$0xff] %v1205_v2 }
 0x248   : > { %v1645_v3 = vpop.f32.mrb[40].mxu1 }
 0x249   : > { %v1226_v54 = vadd.f32 %v1645_v3, %v1396_v0  ;;  %v1217_v4 = vpop.f32.mrb[41].mxu1 }
 0x24a   : > { %v1218_v5 = vadd.f32 %v1396_v0, %v1217_v4  ;;  %v1646_v7 = vpop.f32.mrb[42].mxu1 }
 0x24b   : > { %1258 = vst [vmem:[%s2239_s26 + $0x50] sm:$0xff] %v1226_v54  ;;  %v1229_v57 = vadd.f32 %v1646_v7, %v1396_v0  ;;  %v1220_v8 = vpop.f32.mrb[43].mxu1 }
 0x24c   : > { %1256 = vst [vmem:[%s2239_s26 + $0x40] sm:$0xff] %v1218_v5  ;;  %v1221_v11 = vadd.f32 %v1396_v0, %v1220_v8 }
 0x24d   : > { %1259 = vst [vmem:[%s2239_s26 + $0x58] sm:$0xff] %v1229_v57 }
 0x24e   : > { %1257 = vst [vmem:[%s2239_s26 + $0x48] sm:$0xff] %v1221_v11 }
 0x258   : > { %v1649_v12 = vpop.f32.mrb[44].mxu1 }
 0x259   : > { %v1242_v13 = vadd.f32 %v1649_v12, %v1396_v0  ;;  %v1233_v14 = vpop.f32.mrb[45].mxu1 }
 0x25a   : > { %v1234_v15 = vadd.f32 %v1396_v0, %v1233_v14  ;;  %v1650_v6 = vpop.f32.mrb[46].mxu1 }
 0x25b   : > { %1262 = vst [vmem:[%s2239_s26 + $0x70] sm:$0xff] %v1242_v13  ;;  %v1245_v17 = vadd.f32 %v1650_v6, %v1396_v0  ;;  %v1236_v18 = vpop.f32.mrb[47].mxu1 }
 0x25c   : > { %1260 = vst [vmem:[%s2239_s26 + $0x60] sm:$0xff] %v1234_v15  ;;  %v1237_v20 = vadd.f32 %v1396_v0, %v1236_v18 }
 0x25d   : > { %1263 = vst [vmem:[%s2239_s26 + $0x78] sm:$0xff] %v1245_v17 }
 0x25e   : > { %1261 = vst [vmem:[%s2239_s26 + $0x68] sm:$0xff] %v1237_v20 }
 0x25f   : > { %1762 = shalt.err (!%p1759_p3)
}
 0x260   : > { %s1763_s13 = scalar_lea.hbm %s2259_s8, 2048  ;;  %s1767_s16 = scalar_lea.hbm %s2314_s5, 4096 }
 0x261   : > { %p1764_p4 = scmp.ne.s32.totalorder %s2259_s8, %s1763_s13  ;;  %p1768_p9 = scmp.lt.u32.totalorder %s2259_s8, %s2314_s5 }
 0x262   : > { %p1769_p10 = scmp.lt.u32.totalorder %s1767_s16, %s1763_s13  ;;  %p1771_p12 = scmp.lt.u32.totalorder %s1763_s13, %s2259_s8 }
 0x263   : > { %p1765_p7 = pnand %p1764_p4, %p1884_p5 }
 0x264   : > { %p1770_p11 = por %p1769_p10, %p1768_p9 }
 0x265   : > { %p1766_p8 = pneg %p1765_p7 }
 0x266   : > { %p1772_p13 = por %p1771_p12, %p1770_p11 }
 0x268   : > { %p1773_p0 = pnand %p1772_p13, %p1766_p8 }
 0x26a   : > { %1776 = shalt.err (!%p1773_p0)
}
 0x26b   : > { %s1814_s26 = smov 128   ;;  %s1815_s25 = smov 8  }
 0x26c   : > { %1652 = dma.vmem_to_hbm [thread:$0]  (%p1884_p5), %s2261_s30, 2048, %s2259_s8, %s2268_s22, %s1814_s26, %s1814_s26, %s1815_s25  }
 0x26d PF: > { %p1658_p1 = scmp.ge.s32.totalorder %s1811_s21, 2  ;;  %s1293_s6 = sand.u32 1, %s1799_s18  }
 0x26e   : > { %s1294_s7 = scalar_lea.sflag [#allocation3], %s1293_s6 }
 0x26f   : > { %p1655_p2 = pnand %p1658_p1, %p1888_p6 }
 0x271   : > { %1794 = dma.done.wait (!%p1655_p2), %s1294_s7, 2048  }
 0x272   : > { %1796 = vsyncadd (!%p1655_p2), %s1294_s7, 4294965248  ;;  %p15_p3 = scmp.ge.s32.totalorder %s1871_s24, 4   ;;  %s2317_s18 = smov %s1803_s19 }
 0x273   : > { %s2318_s19 = smov %s1807_s20  ;;  %s2319_s20 = smov %s1882_s27 }
 0x274   : > { %s2320_s21 = smov %s1871_s24  ;;  %17 = sbr.rel (!%p15_p3) target bundleno = 3 (0x3), region = 75 }
 0x27b   :  { %1299 = vsyncpa [#allocation3], 1 }
 0x27c   :  { %1301 = vsyncpa [#allocation3 + $0x1], 1 }

</bundles_post_ra>
